<compile_context>
chip_gen: v7x
topology: tpu7x:2x2x1
jax: 0.10.0
libtpu: 0.0.40
codegen_flags: <defaults>
</compile_context>

<pallas_src>
import functools

import jax
import jax.numpy as jnp
from jax import lax
from jax.experimental import pallas as pl
from jax.experimental.pallas import tpu as pltpu


def _attention_kernel(x_ref, wqkv_ref, wout_ref, b_ref, o_ref, *, heads, dim_head):
    # x_ref:    (N, D)          one batch element, compute dtype (bf16 or f32)
    # wqkv_ref: (D, 3*inner)    fused qkv weight, softmax scale pre-folded into q columns
    # wout_ref: (inner, D)      output projection weight
    # b_ref:    (1, D) f32      output projection bias
    # o_ref:    (N, D)          output block for this batch element
    inner = heads * dim_head
    cdt = x_ref.dtype  # compute dtype for MXU inputs

    x = x_ref[...]                                                        # (N, D)

    # Fused QKV projection for ALL heads in one MXU call (lane width 3*inner).
    qkv = jnp.dot(x, wqkv_ref[...], preferred_element_type=jnp.float32)   # (N, 3*inner) f32
    qkv_c = qkv.astype(cdt)

    head_outs = []
    # `heads` is a static Python int -> unrolled loop with static lane slices;
    # each head's (N, N) score tile dies right after its PV matmul.
    for h in range(heads):
        lo = h * dim_head
        q = qkv_c[:, lo:lo + dim_head]                                    # (N, dh), scale folded
        k = qkv_c[:, inner + lo:inner + lo + dim_head]                    # (N, dh)
        v = qkv_c[:, 2 * inner + lo:2 * inner + lo + dim_head]            # (N, dh)

        # q @ k^T without an explicit transpose: contract the last axes of both operands.
        s = lax.dot_general(q, k, (((1,), (1,)), ((), ())),
                            preferred_element_type=jnp.float32)           # (N, N) f32

        # Numerically-stable softmax, fully in f32.  Exact division (NOT approx
        # reciprocal) to stay within tight tolerance of the PyTorch softmax.
        s = s - jnp.max(s, axis=-1, keepdims=True)
        p = jnp.exp(s)
        attn = p / jnp.sum(p, axis=-1, keepdims=True)

        head_outs.append(
            jnp.dot(attn.astype(cdt), v, preferred_element_type=jnp.float32))  # (N, dh) f32

    # Fused output projection: concat heads (order h*dh + d == 'b h n d -> b n (h d)')
    # and do ONE (N, inner) @ (inner, D) matmul with full contraction depth, then bias.
    o_concat = jnp.concatenate(head_outs, axis=-1).astype(cdt)            # (N, inner)
    out = jnp.dot(o_concat, wout_ref[...], preferred_element_type=jnp.float32)  # (N, D) f32
    o_ref[...] = (out + b_ref[...]).astype(o_ref.dtype)


def prepare_attention_params(w_qkv, w_out, b_out, *, heads, dim_head,
                             compute_dtype=jnp.bfloat16):
    """One-time weight prep (hoisted out of the per-call path): fold the softmax
    scale into the q columns and cast matmul operands to the compute dtype."""
    D = w_qkv.shape[0]
    inner = heads * dim_head
    assert w_qkv.shape == (D, 3 * inner)
    assert w_out.shape == (inner, D)
    scale = dim_head ** (-0.5)
    w_qkv_scaled = w_qkv.at[:, :inner].multiply(scale)   # scale only the q columns
    return dict(
        w_qkv=w_qkv_scaled.astype(compute_dtype),
        w_out=w_out.astype(compute_dtype),
        b_out=b_out.reshape(1, D).astype(jnp.float32),
    )


@functools.partial(jax.jit, static_argnames=("heads", "dim_head"))
def attention_forward(x, params, *, heads, dim_head):
    B, N, D = x.shape
    inner = heads * dim_head
    compute_dtype = params["w_qkv"].dtype
    x_c = x.astype(compute_dtype)

    kernel = functools.partial(_attention_kernel, heads=heads, dim_head=dim_head)

    return pl.pallas_call(
        kernel,
        out_shape=jax.ShapeDtypeStruct((B, N, D), x.dtype),
        grid_spec=pltpu.PrefetchScalarGridSpec(
            num_scalar_prefetch=0,
            grid=(B,),
            in_specs=[
                # Per-batch activation block.
                pl.BlockSpec((None, N, D), lambda b: (b, 0, 0)),
                # Weights / bias: constant index_map -> DMA'd once, resident in VMEM
                # for the whole grid (no per-batch re-streaming).
                pl.BlockSpec((D, 3 * inner), lambda b: (0, 0)),
                pl.BlockSpec((inner, D), lambda b: (0, 0)),
                pl.BlockSpec((1, D), lambda b: (0, 0)),
            ],
            out_specs=pl.BlockSpec((None, N, D), lambda b: (b, 0, 0)),
        ),
        compiler_params=pltpu.CompilerParams(
            dimension_semantics=("parallel",),
            vmem_limit_bytes=64 * 1024 * 1024,
        ),
    )(x_c, params["w_qkv"], params["w_out"], params["b_out"])


def attention_reference(x, w_qkv, w_out, b_out, *, heads, dim_head):
    # Pure-JAX reference mirroring the PyTorch module (eval mode, dropout = identity).
    B, N, D = x.shape
    inner = heads * dim_head
    scale = dim_head ** (-0.5)
    qkv = jnp.einsum("bnd,de->bne", x, w_qkv, precision="highest")
    q, k, v = jnp.split(qkv, 3, axis=-1)

    def to_heads(t):
        return t.reshape(B, N, heads, dim_head).transpose(0, 2, 1, 3)  # (B, H, N, dh)

    q, k, v = map(to_heads, (q, k, v))
    dots = jnp.einsum("bhnd,bhmd->bhnm", q, k, precision="highest") * scale
    attn = jax.nn.softmax(dots, axis=-1)
    out = jnp.einsum("bhnm,bhmd->bhnd", attn, v, precision="highest")
    out = out.transpose(0, 2, 1, 3).reshape(B, N, inner)
    return jnp.einsum("bne,ed->bnd", out, w_out, precision="highest") + b_out


if __name__ == "__main__":
    # Small shapes consistent with the module.
    B, N, D = 2, 8, 32
    heads, dim_head = 4, 8
    inner = heads * dim_head

    key = jax.random.PRNGKey(0)
    k1, k2, k3, k4 = jax.random.split(key, 4)

    x = jax.random.normal(k1, (B, N, D), dtype=jnp.float32)
    # Deterministic synthetic parameters (no checkpoint load).
    w_qkv = jax.random.normal(k2, (D, 3 * inner), dtype=jnp.float32) * (1.0 / jnp.sqrt(D))
    w_out = jax.random.normal(k3, (inner, D), dtype=jnp.float32) * (1.0 / jnp.sqrt(inner))
    b_out = jax.random.normal(k4, (D,), dtype=jnp.float32) * 0.01

    y_ref = attention_reference(x, w_qkv, w_out, b_out, heads=heads, dim_head=dim_head)

    # f32 compute path: strict parity with the (eval-mode) PyTorch module.
    params_f32 = prepare_attention_params(
        w_qkv, w_out, b_out, heads=heads, dim_head=dim_head, compute_dtype=jnp.float32)
    y_f32 = jax.block_until_ready(
        attention_forward(x, params_f32, heads=heads, dim_head=dim_head))
    assert y_f32.shape == (B, N, D)
    assert jnp.allclose(y_f32, y_ref, atol=2e-3, rtol=2e-3), "f32 kernel mismatch vs reference"

    # bf16 compute path (default, MXU-friendly): looser tolerance for bf16 matmul inputs.
    params_bf16 = prepare_attention_params(
        w_qkv, w_out, b_out, heads=heads, dim_head=dim_head, compute_dtype=jnp.bfloat16)
    y_bf16 = jax.block_until_ready(
        attention_forward(x, params_bf16, heads=heads, dim_head=dim_head))
    assert y_bf16.shape == (B, N, D)
    assert jnp.allclose(y_bf16, y_ref, atol=5e-2, rtol=5e-2), "bf16 kernel mismatch vs reference"

    print("KERNEL_OK")
</pallas_src>

<mosaic_0001>
module attributes {stable_mosaic.version = 11 : i64} {
  func.func @_attention_kernel(%arg0: i32, %arg1: memref<1x8x32xf32, #tpu.memory_space<vmem>>, %arg2: memref<32x96xf32, #tpu.memory_space<vmem>>, %arg3: memref<32x32xf32, #tpu.memory_space<vmem>>, %arg4: memref<1x32xf32, #tpu.memory_space<vmem>>, %arg5: memref<1x8x32xf32, #tpu.memory_space<vmem>>) attributes {dimension_semantics = [#tpu.dimension_semantics<parallel>], iteration_bounds = array<i64: 2>, scalar_prefetch = 0 : i64, scratch_operands = 0 : i64, tpu.core_type = #tpu.core_type<tc>, window_params = [{transform_indices = @transform_0, window_bounds = array<i64: 1, 8, 32>}, {pipeline_mode = #tpu.pipeline_mode<synchronous>, transform_indices = @transform_1, window_bounds = array<i64: 32, 96>}, {pipeline_mode = #tpu.pipeline_mode<synchronous>, transform_indices = @transform_2, window_bounds = array<i64: 32, 32>}, {pipeline_mode = #tpu.pipeline_mode<synchronous>, transform_indices = @transform_3, window_bounds = array<i64: 1, 32>}, {transform_indices = @transform_4, window_bounds = array<i64: 1, 8, 32>}]} {
    %c0 = arith.constant 0 : index
    %c0_0 = arith.constant 0 : index
    %c0_1 = arith.constant 0 : index
    %0 = vector.load %arg1[%c0, %c0_0, %c0_1] : memref<1x8x32xf32, #tpu.memory_space<vmem>>, vector<1x8x32xf32>
    %1 = vector.shape_cast %0 : vector<1x8x32xf32> to vector<8x32xf32>
    %c0_2 = arith.constant 0 : index
    %c0_3 = arith.constant 0 : index
    %2 = vector.load %arg2[%c0_2, %c0_3] : memref<32x96xf32, #tpu.memory_space<vmem>>, vector<32x96xf32>
    %cst = arith.constant dense<0.000000e+00> : vector<8x96xf32>
    %3 = tpu.matmul %1, %2, %cst {dimension_numbers = #tpu.dot_dimension_numbers<[1], [0], [0], [1], [0, 0, 1, 1], [], []>} : vector<8x32xf32>, vector<32x96xf32>, vector<8x96xf32> -> vector<8x96xf32>
    %4 = vector.extract_strided_slice %3 {offsets = [0, 0], sizes = [8, 8], strides = [1, 1]} : vector<8x96xf32> to vector<8x8xf32>
    %5 = vector.extract_strided_slice %3 {offsets = [0, 32], sizes = [8, 8], strides = [1, 1]} : vector<8x96xf32> to vector<8x8xf32>
    %6 = vector.extract_strided_slice %3 {offsets = [0, 64], sizes = [8, 8], strides = [1, 1]} : vector<8x96xf32> to vector<8x8xf32>
    %cst_4 = arith.constant dense<0.000000e+00> : vector<8x8xf32>
    %7 = tpu.matmul %4, %5, %cst_4 {dimension_numbers = #tpu.dot_dimension_numbers<[1], [1], [0], [0], [0, 0, 1, 0], [], []>} : vector<8x8xf32>, vector<8x8xf32>, vector<8x8xf32> -> vector<8x8xf32>
    %cst_5 = arith.constant dense<0xFF800000> : vector<8xf32>
    %8 = vector.multi_reduction <maximumf>, %7, %cst_5 [1] : vector<8x8xf32> to vector<8xf32>
    %9 = vector.shape_cast %8 : vector<8xf32> to vector<8x1xf32>
    %10 = vector.broadcast %9 : vector<8x1xf32> to vector<8x8xf32>
    %11 = arith.subf %7, %10 : vector<8x8xf32>
    %12 = math.exp %11 : vector<8x8xf32>
    %cst_6 = arith.constant dense<0.000000e+00> : vector<8xf32>
    %13 = vector.multi_reduction <add>, %12, %cst_6 [1] : vector<8x8xf32> to vector<8xf32>
    %14 = vector.shape_cast %13 : vector<8xf32> to vector<8x1xf32>
    %15 = vector.broadcast %14 : vector<8x1xf32> to vector<8x8xf32>
    %16 = arith.divf %12, %15 : vector<8x8xf32>
    %cst_7 = arith.constant dense<0.000000e+00> : vector<8x8xf32>
    %17 = tpu.matmul %16, %6, %cst_7 {dimension_numbers = #tpu.dot_dimension_numbers<[1], [0], [0], [1], [0, 0, 1, 1], [], []>} : vector<8x8xf32>, vector<8x8xf32>, vector<8x8xf32> -> vector<8x8xf32>
    %18 = vector.extract_strided_slice %3 {offsets = [0, 8], sizes = [8, 8], strides = [1, 1]} : vector<8x96xf32> to vector<8x8xf32>
    %19 = vector.extract_strided_slice %3 {offsets = [0, 40], sizes = [8, 8], strides = [1, 1]} : vector<8x96xf32> to vector<8x8xf32>
    %20 = vector.extract_strided_slice %3 {offsets = [0, 72], sizes = [8, 8], strides = [1, 1]} : vector<8x96xf32> to vector<8x8xf32>
    %cst_8 = arith.constant dense<0.000000e+00> : vector<8x8xf32>
    %21 = tpu.matmul %18, %19, %cst_8 {dimension_numbers = #tpu.dot_dimension_numbers<[1], [1], [0], [0], [0, 0, 1, 0], [], []>} : vector<8x8xf32>, vector<8x8xf32>, vector<8x8xf32> -> vector<8x8xf32>
    %cst_9 = arith.constant dense<0xFF800000> : vector<8xf32>
    %22 = vector.multi_reduction <maximumf>, %21, %cst_9 [1] : vector<8x8xf32> to vector<8xf32>
    %23 = vector.shape_cast %22 : vector<8xf32> to vector<8x1xf32>
    %24 = vector.broadcast %23 : vector<8x1xf32> to vector<8x8xf32>
    %25 = arith.subf %21, %24 : vector<8x8xf32>
    %26 = math.exp %25 : vector<8x8xf32>
    %cst_10 = arith.constant dense<0.000000e+00> : vector<8xf32>
    %27 = vector.multi_reduction <add>, %26, %cst_10 [1] : vector<8x8xf32> to vector<8xf32>
    %28 = vector.shape_cast %27 : vector<8xf32> to vector<8x1xf32>
    %29 = vector.broadcast %28 : vector<8x1xf32> to vector<8x8xf32>
    %30 = arith.divf %26, %29 : vector<8x8xf32>
    %cst_11 = arith.constant dense<0.000000e+00> : vector<8x8xf32>
    %31 = tpu.matmul %30, %20, %cst_11 {dimension_numbers = #tpu.dot_dimension_numbers<[1], [0], [0], [1], [0, 0, 1, 1], [], []>} : vector<8x8xf32>, vector<8x8xf32>, vector<8x8xf32> -> vector<8x8xf32>
    %32 = vector.extract_strided_slice %3 {offsets = [0, 16], sizes = [8, 8], strides = [1, 1]} : vector<8x96xf32> to vector<8x8xf32>
    %33 = vector.extract_strided_slice %3 {offsets = [0, 48], sizes = [8, 8], strides = [1, 1]} : vector<8x96xf32> to vector<8x8xf32>
    %34 = vector.extract_strided_slice %3 {offsets = [0, 80], sizes = [8, 8], strides = [1, 1]} : vector<8x96xf32> to vector<8x8xf32>
    %cst_12 = arith.constant dense<0.000000e+00> : vector<8x8xf32>
    %35 = tpu.matmul %32, %33, %cst_12 {dimension_numbers = #tpu.dot_dimension_numbers<[1], [1], [0], [0], [0, 0, 1, 0], [], []>} : vector<8x8xf32>, vector<8x8xf32>, vector<8x8xf32> -> vector<8x8xf32>
    %cst_13 = arith.constant dense<0xFF800000> : vector<8xf32>
    %36 = vector.multi_reduction <maximumf>, %35, %cst_13 [1] : vector<8x8xf32> to vector<8xf32>
    %37 = vector.shape_cast %36 : vector<8xf32> to vector<8x1xf32>
    %38 = vector.broadcast %37 : vector<8x1xf32> to vector<8x8xf32>
    %39 = arith.subf %35, %38 : vector<8x8xf32>
    %40 = math.exp %39 : vector<8x8xf32>
    %cst_14 = arith.constant dense<0.000000e+00> : vector<8xf32>
    %41 = vector.multi_reduction <add>, %40, %cst_14 [1] : vector<8x8xf32> to vector<8xf32>
    %42 = vector.shape_cast %41 : vector<8xf32> to vector<8x1xf32>
    %43 = vector.broadcast %42 : vector<8x1xf32> to vector<8x8xf32>
    %44 = arith.divf %40, %43 : vector<8x8xf32>
    %cst_15 = arith.constant dense<0.000000e+00> : vector<8x8xf32>
    %45 = tpu.matmul %44, %34, %cst_15 {dimension_numbers = #tpu.dot_dimension_numbers<[1], [0], [0], [1], [0, 0, 1, 1], [], []>} : vector<8x8xf32>, vector<8x8xf32>, vector<8x8xf32> -> vector<8x8xf32>
    %46 = vector.extract_strided_slice %3 {offsets = [0, 24], sizes = [8, 8], strides = [1, 1]} : vector<8x96xf32> to vector<8x8xf32>
    %47 = vector.extract_strided_slice %3 {offsets = [0, 56], sizes = [8, 8], strides = [1, 1]} : vector<8x96xf32> to vector<8x8xf32>
    %48 = vector.extract_strided_slice %3 {offsets = [0, 88], sizes = [8, 8], strides = [1, 1]} : vector<8x96xf32> to vector<8x8xf32>
    %cst_16 = arith.constant dense<0.000000e+00> : vector<8x8xf32>
    %49 = tpu.matmul %46, %47, %cst_16 {dimension_numbers = #tpu.dot_dimension_numbers<[1], [1], [0], [0], [0, 0, 1, 0], [], []>} : vector<8x8xf32>, vector<8x8xf32>, vector<8x8xf32> -> vector<8x8xf32>
    %cst_17 = arith.constant dense<0xFF800000> : vector<8xf32>
    %50 = vector.multi_reduction <maximumf>, %49, %cst_17 [1] : vector<8x8xf32> to vector<8xf32>
    %51 = vector.shape_cast %50 : vector<8xf32> to vector<8x1xf32>
    %52 = vector.broadcast %51 : vector<8x1xf32> to vector<8x8xf32>
    %53 = arith.subf %49, %52 : vector<8x8xf32>
    %54 = math.exp %53 : vector<8x8xf32>
    %cst_18 = arith.constant dense<0.000000e+00> : vector<8xf32>
    %55 = vector.multi_reduction <add>, %54, %cst_18 [1] : vector<8x8xf32> to vector<8xf32>
    %56 = vector.shape_cast %55 : vector<8xf32> to vector<8x1xf32>
    %57 = vector.broadcast %56 : vector<8x1xf32> to vector<8x8xf32>
    %58 = arith.divf %54, %57 : vector<8x8xf32>
    %cst_19 = arith.constant dense<0.000000e+00> : vector<8x8xf32>
    %59 = tpu.matmul %58, %48, %cst_19 {dimension_numbers = #tpu.dot_dimension_numbers<[1], [0], [0], [1], [0, 0, 1, 1], [], []>} : vector<8x8xf32>, vector<8x8xf32>, vector<8x8xf32> -> vector<8x8xf32>
    %60 = tpu.concatenate %17, %31, %45, %59 in 1 : vector<8x8xf32>, vector<8x8xf32>, vector<8x8xf32>, vector<8x8xf32> -> vector<8x32xf32>
    %c0_20 = arith.constant 0 : index
    %c0_21 = arith.constant 0 : index
    %61 = vector.load %arg3[%c0_20, %c0_21] : memref<32x32xf32, #tpu.memory_space<vmem>>, vector<32x32xf32>
    %cst_22 = arith.constant dense<0.000000e+00> : vector<8x32xf32>
    %62 = tpu.matmul %60, %61, %cst_22 {dimension_numbers = #tpu.dot_dimension_numbers<[1], [0], [0], [1], [0, 0, 1, 1], [], []>} : vector<8x32xf32>, vector<32x32xf32>, vector<8x32xf32> -> vector<8x32xf32>
    %c0_23 = arith.constant 0 : index
    %c0_24 = arith.constant 0 : index
    %63 = vector.load %arg4[%c0_23, %c0_24] : memref<1x32xf32, #tpu.memory_space<vmem>>, vector<1x32xf32>
    %64 = vector.broadcast %63 : vector<1x32xf32> to vector<8x32xf32>
    %65 = arith.addf %62, %64 : vector<8x32xf32>
    %c0_25 = arith.constant 0 : index
    %c0_26 = arith.constant 0 : index
    %c0_27 = arith.constant 0 : index
    %66 = vector.load %arg5[%c0_25, %c0_26, %c0_27] : memref<1x8x32xf32, #tpu.memory_space<vmem>>, vector<1x8x32xf32>
    %67 = vector.shape_cast %66 : vector<1x8x32xf32> to vector<8x32xf32>
    %68 = vector.shape_cast %65 : vector<8x32xf32> to vector<1x8x32xf32>
    tpu.vector_store %arg5[%c0_25, %c0_26, %c0_27], %68 {strides = array<i32>} : memref<1x8x32xf32, #tpu.memory_space<vmem>>, vector<1x8x32xf32>,
    return
  }
  func.func @transform_0(%arg0: i32) -> (i32, i32, i32) {
    %c0_i32 = arith.constant 0 : i32
    %c0_i32_0 = arith.constant 0 : i32
    %c0_i32_1 = arith.constant 0 : i32
    return %arg0, %c0_i32, %c0_i32_0 : i32, i32, i32
  }
  func.func @transform_1(%arg0: i32) -> (i32, i32) {
    %c0_i32 = arith.constant 0 : i32
    %c0_i32_0 = arith.constant 0 : i32
    %c0_i32_1 = arith.constant 0 : i32
    return %c0_i32, %c0_i32_0 : i32, i32
  }
  func.func @transform_2(%arg0: i32) -> (i32, i32) {
    %c0_i32 = arith.constant 0 : i32
    %c0_i32_0 = arith.constant 0 : i32
    %c0_i32_1 = arith.constant 0 : i32
    return %c0_i32, %c0_i32_0 : i32, i32
  }
  func.func @transform_3(%arg0: i32) -> (i32, i32) {
    %c0_i32 = arith.constant 0 : i32
    %c0_i32_0 = arith.constant 0 : i32
    %c0_i32_1 = arith.constant 0 : i32
    return %c0_i32, %c0_i32_0 : i32, i32
  }
  func.func @transform_4(%arg0: i32) -> (i32, i32, i32) {
    %c0_i32 = arith.constant 0 : i32
    %c0_i32_0 = arith.constant 0 : i32
    %c0_i32_1 = arith.constant 0 : i32
    return %arg0, %c0_i32, %c0_i32_0 : i32, i32, i32
  }
}

</mosaic_0001>

<bundles_post_ra>
// kernel: attention_forward.1
= control target key start
LH: loop header
LB: loop body
LE: loop exit
PB: predicated region body
PF: predicated region fallthrough
CT: control target
= control target key end

     0   :  { %9 = vsyncpa [#allocation3], 0  ;;  %s2024_s0 = inlined_call_operand.hbm [shape: f32[2,8,32], index: 0, kind: input, shape index: {}]   ;;  %s2025_s1 = inlined_call_operand.hbm [shape: f32[32,96], index: 1, kind: input, shape index: {}]   ;;  %s2026_s2 = inlined_call_operand.hbm [shape: f32[32,32], index: 2, kind: input, shape index: {}]   ;;  %s2027_s3 = inlined_call_operand.hbm [shape: f32[1,32], index: 3, kind: input, shape index: {}]   ;;  %s2028_s4 = inlined_call_operand.hbm [shape: f32[2,8,32], index: 4, kind: output, shape index: {}]  }
   0x1   :  { %11 = vsyncpa [#allocation3 + $0x1], 0 }
   0x2   :  { %12 = vsyncpa [#allocation6], 0 }
   0x3   :  { %13 = vsyncpa [#allocation9], 0 }
   0x4   :  { %14 = vsyncpa [#allocation4], 0 }
   0x5   :  { %16 = vsyncpa [#allocation4 + $0x1], 0  ;;  %s1693_s15 = smov 0   ;;  %s1695_s16 = smov 0  }
   0x6   :  { %s1697_s17 = smov 0   ;;  %s1699_s18 = smov 0  }
   0x7 LB: > { %s1714_s19 = sadd.s32 4294967295, %s1642_s18   ;;  %s1209_s20 = sadd.s32 4294967294, %s1642_s18   ;;  %s1642_s18 = sphi %s1699_s18, %s2051_s18   ;;  %s1638_s17 = sphi %s1697_s17, %s2050_s17   ;;  %s1634_s16 = sphi %s1695_s16, %s2049_s16   ;;  %s1630_s15 = sphi %s1693_s15, %s2048_s15  }
   0x8   : > { %p42_p0 = scmp.ne.s32.totalorder %s1634_s16, %s1630_s15  ;;  %p2029_p1 = scmp.eq.s32.totalorder %s1714_s19, 0 }
   0x9   : > { %p135_p3 = scmp.eq.s32.totalorder %s1209_s20, 1  ;;  %p1210_p5 = scmp.ge.s32.totalorder %s1642_s18, 1 }
   0xa   : > { %p1723_p4 = por %p2029_p1, %p42_p0  ;;  %p142_p7 = scmp.lt.s32.totalorder %s1642_s18, 3 }
   0xb   : > { %p1728_p6 = por %p135_p3, %p42_p0  ;;  %s1644_s24 = smov [#allocation5]  }
   0xc   : > { %s2032_s21 = scalar_select %p1723_p4, 1, 0 }
   0xd   : > { %s2033_s22 = scalar_select %p1728_p6, 1, 0 }
   0xe   : > { %p1733_p8 = pnand %p1210_p5, %p142_p7  ;;  %s154_s25 = sshll.u32 %s1644_s24, 4  ;;  %s1737_s25 = int_to_ptr.vmem [resolvable:$true] %s154_s25 }
   0xf   : > { %s1645_s27 = smov [#allocation7]   ;;  %s1646_s29 = smov [#allocation8]  }
  0x10   : > { %s2034_s23 = scalar_select %p1733_p8, 1, 0 }
  0x11   : > { %p1358_p9 = pneg %p1733_p8  ;;  %s167_s28 = sshll.u32 %s1645_s27, 4  ;;  %s1748_s28 = int_to_ptr.vmem [resolvable:$true] %s167_s28 }
  0x12   : > { %s1750_s30 = sshll.u32 %s1646_s29, 4  ;;  %s1454_s7 = scalar_lea.hbm %s2025_s1, 512  ;;  %s182_s30 = int_to_ptr.vmem [resolvable:$true] %s1750_s30 }
  0x13   : > { %p1744_p11 = pnand %p1358_p9, %p2029_p1  ;;  %p1455_p12 = scmp.ne.s32.totalorder %s2025_s1, %s1454_s7 }
  0x14   : > { %p1461_p5 = scmp.lt.u32.totalorder %s1454_s7, %s2025_s1 }
  0x15   : > { %p1760_p13 = pneg %p1744_p11 }
  0x17   : > { %p1457_p0 = pnand %p1760_p13, %p1455_p12 }
  0x19   : > { %p1458_p3 = pneg %p1457_p0 }
  0x1b   : > { %p1463_p7 = pnand %p1461_p5, %p1458_p3 }
  0x1d   : > { %1466 = shalt.err (!%p1463_p7)
}
  0x1e   : > { %s1467_s13 = scalar_lea.vmem %s1737_s25, 512  ;;  %p1475_p2 = scmp.lt.s32.totalorder %s1737_s25, %s1737_s25 }
  0x1f   : > { %p1468_p9 = scmp.ne.s32.totalorder %s1737_s25, %s1467_s13  ;;  %p1476_p6 = scmp.lt.s32.totalorder %s1467_s13, %s1467_s13 }
  0x21   : > { %p1470_p10 = pnand %p1468_p9, %p1760_p13  ;;  %p1477_p12 = por %p1476_p6, %p1475_p2 }
  0x23   : > { %p1471_p1 = pneg %p1470_p10 }
  0x25   : > { %p1478_p0 = pnand %p1477_p12, %p1471_p1 }
  0x27   : > { %1481 = shalt.err (!%p1478_p0)
}
  0x28   : > { %s1647_s14 = smov 128   ;;  %s1648_s20 = smov 8  }
  0x29   : > { %1361 = dma.hbm_to_vmem [thread:$0]  (!%p1744_p11), %s2025_s1, 512, %s1737_s25, [#allocation6], %s1647_s14, %s1647_s14, %s1648_s20  }
  0x2a   : > { %s1482_s6 = scalar_lea.hbm %s2026_s2, 512 }
  0x2b   : > { %p1483_p2 = scmp.ne.s32.totalorder %s2026_s2, %s1482_s6  ;;  %p1489_p10 = scmp.lt.u32.totalorder %s1482_s6, %s2026_s2 }
  0x2d   : > { %p1485_p1 = pnand %p1483_p2, %p1760_p13 }
  0x2f   : > { %p1486_p6 = pneg %p1485_p1 }
  0x31   : > { %p1491_p3 = pnand %p1489_p10, %p1486_p6 }
  0x33   : > { %1494 = shalt.err (!%p1491_p3)
}
  0x34   : > { %s1495_s25 = scalar_lea.vmem %s1748_s28, 512  ;;  %p1503_p12 = scmp.lt.s32.totalorder %s1748_s28, %s1748_s28 }
  0x35   : > { %p1496_p5 = scmp.ne.s32.totalorder %s1748_s28, %s1495_s25  ;;  %p1504_p0 = scmp.lt.s32.totalorder %s1495_s25, %s1495_s25 }
  0x37   : > { %p1498_p7 = pnand %p1496_p5, %p1760_p13  ;;  %p1505_p2 = por %p1504_p0, %p1503_p12 }
  0x39   : > { %p1499_p9 = pneg %p1498_p7 }
  0x3b   : > { %p1506_p1 = pnand %p1505_p2, %p1499_p9 }
  0x3d   : > { %1509 = shalt.err (!%p1506_p1)
}
  0x3e   : > { %1364 = dma.hbm_to_vmem [thread:$0]  (!%p1744_p11), %s2026_s2, 512, %s1748_s28, [#allocation6], %s1647_s14, %s1647_s14, %s1648_s20  }
  0x3f   : > { %s1510_s29 = scalar_lea.hbm %s2027_s3, 16 }
  0x40   : > { %p1511_p6 = scmp.ne.s32.totalorder %s2027_s3, %s1510_s29  ;;  %p1517_p5 = scmp.lt.u32.totalorder %s1510_s29, %s2027_s3 }
  0x42   : > { %p1513_p10 = pnand %p1511_p6, %p1760_p13 }
  0x44   : > { %p1514_p3 = pneg %p1513_p10 }
  0x46   : > { %p1519_p7 = pnand %p1517_p5, %p1514_p3 }
  0x48   : > { %1522 = shalt.err (!%p1519_p7)
}
  0x49   : > { %s1523_s9 = scalar_lea.vmem %s182_s30, 16  ;;  %s1530_s28 = scalar_lea.vmem %s182_s30, 32 }
  0x4a   : > { %p1524_p9 = scmp.ne.s32.totalorder %s182_s30, %s1523_s9  ;;  %p1531_p2 = scmp.lt.s32.totalorder %s182_s30, %s182_s30 }
  0x4b   : > { %p1532_p1 = scmp.lt.s32.totalorder %s1530_s28, %s1523_s9 }
  0x4c   : > { %p1526_p12 = pnand %p1524_p9, %p1760_p13 }
  0x4d   : > { %p1533_p4 = por %p1532_p1, %p1531_p2 }
  0x4e   : > { %p1527_p0 = pneg %p1526_p12 }
  0x50   : > { %p1534_p8 = pnand %p1533_p4, %p1527_p0 }
  0x52   : > { %1537 = shalt.err (!%p1534_p8)
}
  0x53   : > { %1367 = dma.hbm_to_vmem [thread:$0]  (!%p1744_p11), %s2027_s3, 16, %s182_s30, [#allocation9]  }
  0x54   : > { %s1824_s10 = sadd.s32 1, %s1642_s18   ;;  %s29_s26 = sadd.s32 1, %s1638_s17 }
  0x55   : > { %s26_s11 = ssub.s32 %s1642_s18, %s1824_s10  ;;  %p36_p8 = scmp.ne.s32.totalorder %s1638_s17, %s1634_s16 }
  0x56   : > { %p27_p4 = scmp.eq.s32.totalorder %s26_s11, 0  ;;  %p37_p13 = scmp.eq.s32.totalorder %s1642_s18, 0 }
  0x57   : > { %p1379_p6 = scmp.lt.s32.totalorder %s1642_s18, 2  ;;  %p2037_p3 = scmp.eq.s32.totalorder %s1714_s19, 1 }
  0x58   : > { %s1834_s25 = scalar_select %p27_p4, %s1638_s17, %s29_s26  }
  0x59   : > { %p38_p10 = por %p37_p13, %p36_p8  ;;  %p1838_p5 = por %p2037_p3, %p36_p8 }
  0x5a   : > { %s192_s13 = sand.u32 1, %s1638_s17   ;;  %s1216_s24 = sshll.u32 %s1642_s18, 7 }
  0x5b   : > { %s1215_s30 = sshll.u32 %s192_s13, 3  ;;  %s1847_s5 = scalar_lea.hbm %s2024_s0, %s1216_s24 }
  0x5c   : > { %s196_s6 = scalar_lea.vmem [#allocation2], %s1215_s30  ;;  %p1849_p11 = pnand %p1379_p6, %p38_p10 }
  0x5d   : > { %s203_s7 = sshll.u32 %s196_s6, 4  ;;  %s193_s9 = scalar_lea.sflag [#allocation3], %s192_s13  ;;  %s1853_s7 = int_to_ptr.vmem [resolvable:$true] %s203_s7 }
  0x5e   : > { %s1538_s28 = scalar_lea.hbm %s1847_s5, 128  ;;  %p1540_p9 = pneg %p1849_p11 }
  0x5f   : > { %p1539_p7 = scmp.ne.s32.totalorder %s1847_s5, %s1538_s28  ;;  %s1543_s11 = scalar_lea.hbm %s2024_s0, 256 }
  0x60   : > { %p1544_p2 = scmp.lt.u32.totalorder %s1847_s5, %s2024_s0  ;;  %p1545_p1 = scmp.lt.u32.totalorder %s1543_s11, %s1538_s28 }
  0x61   : > { %p1541_p12 = pnand %p1540_p9, %p1539_p7  ;;  %p1547_p8 = scmp.lt.u32.totalorder %s1538_s28, %s1847_s5 }
  0x62   : > { %p1546_p4 = por %p1545_p1, %p1544_p2 }
  0x63   : > { %p1542_p0 = pneg %p1541_p12 }
  0x64   : > { %p1548_p13 = por %p1547_p8, %p1546_p4 }
  0x66   : > { %p1549_p6 = pnand %p1548_p13, %p1542_p0 }
  0x68   : > { %1552 = shalt.err (!%p1549_p6)
}
  0x69   : > { %s1553_s13 = scalar_lea.vmem %s1853_s7, 128  ;;  %s1649_s30 = smov [#allocation2]  }
  0x6a   : > { %p1554_p10 = scmp.ne.s32.totalorder %s1853_s7, %s1553_s13  ;;  %s1558_s27 = sshll.u32 %s1649_s30, 4  ;;  %s1559_s27 = int_to_ptr.vmem [resolvable:$false] %s1558_s27 }
  0x6b   : > { %s1560_s29 = scalar_lea.vmem %s1559_s27, 256  ;;  %p1561_p12 = scmp.lt.s32.totalorder %s1853_s7, %s1559_s27 }
  0x6c   : > { %p1556_p3 = pnand %p1554_p10, %p1540_p9  ;;  %p1562_p2 = scmp.lt.s32.totalorder %s1560_s29, %s1553_s13 }
  0x6e   : > { %p1557_p7 = pneg %p1556_p3  ;;  %p1563_p1 = por %p1562_p2, %p1561_p12 }
  0x70   : > { %p1564_p4 = pnand %p1563_p1, %p1557_p7 }
  0x72   : > { %1567 = shalt.err (!%p1564_p4)
}
  0x73   : > { %1371 = dma.hbm_to_vmem [thread:$0]  (!%p1849_p11), %s1847_s5, 128, %s1853_s7, %s193_s9  }
  0x74   : > { %p2040_p0 = scmp.ne.s32.totalorder %s2034_s23, 0 }
  0x75   : > { %s1883_s6 = sand.u32 (!%p2040_p0), 1, %s1634_s16   ;;  %p2041_p9 = scmp.ne.s32.totalorder (!%p2040_p0), %s2032_s21, 0 }
  0x76   : > { %212 = sbr.rel (%p2040_p0) target bundleno = 2134 (0x856), region = 36  ;;  %s1218_s28 = sshll.u32 (!%p2040_p0), %s1883_s6, 3 }
  0x77   : > { %s215_s14 = scalar_lea.sflag (!%p2040_p0), [#allocation3], %s1883_s6  ;;  %s218_s20 = scalar_lea.vmem (!%p2040_p0), [#allocation2], %s1218_s28 }
  0x7d   : > { %1613 = dma.done.wait (%p2041_p9), %s215_s14, 128  }
  0x7e   : > { %1615 = vsyncadd (%p2041_p9), %s215_s14, 4294967168  ;;  %p2042_p11 = scmp.eq.s32.totalorder %s1714_s19, 0 }
  0x80   : > { %1617 = dma.done.wait (%p2042_p11), [#allocation6], 1024   ;;  %p2043_p8 = pmov %p2042_p11 }
  0x82   : > { %1619 = vsyncadd (%p2043_p8), [#allocation6], 4294966272  ;;  %p2044_p13 = pmov %p2043_p8 }
  0x83   : > { %p2045_p6 = pmov %p2043_p8 }
  0x84   : > { %1621 = dma.done.wait (%p2044_p13), [#allocation9], 16  }
  0x85   : > { %1623 = vsyncadd (%p2045_p6), [#allocation9], 4294967280  ;;  %v1650_v0 = vmov 0.0|0.0   ;;  %vm1651_vm0 = vmmov 0   ;;  %v1652_v1 = vmov 0.0   ;;  %v256_v2 = vld [vmem:[#allocation5] sm:$0xff] }
  0x86   : > { %1330 = vmatprep.subr.bf16.mxu0 %v1650_v0  ;;  %1276 = vmatprep.mubr.msk.f32.mxu0 %vm1651_vm0, %v1652_v1  ;;  %v257_v3 = vld [vmem:[#allocation5 + $0x8] sm:$0xff]  ;;  %v258_v4 = vld [vmem:[#allocation5 + $0x10] sm:$0xff]  ;;  %v259_v6 = vld [vmem:[#allocation5 + $0x18] sm:$0xff]  ;;  %vm260_vm1 = vcmask 261120   ;;  %s1653_s21 = smov 64   ;;  %s1654_s23 = smov 96  }
  0x87   : > { %1279 = vmatprep.subr.mxu1 %v1652_v1  ;;  %1281 = vmatprep.mubr.msk.f32.mxu1 %vm1651_vm0, %v1652_v1  ;;  %v1331_v5 = vpack.c.bf16 %v257_v3, %v256_v2  ;;  %v1334_v7 = vpack.c.bf16 %v259_v6, %v258_v4  ;;  %v255_v8 = vld [vmem:[%s218_s20] sm:$0xff]  ;;  %s1655_s5 = smov 88   ;;  %s1656_s7 = smov 120   ;;  %vm337_vm2 = vcmask 64512   ;;  %v1011_v6 = vld [vmem:[#allocation7] sm:$0xff]  ;;  %vm1007_vm3 = vcmask 130048  }
  0x88   : > { %s1657_s8 = smov 80   ;;  %s1658_s9 = smov 72   ;;  %vm1009_vm4 = vcmask 195584  }
  0x89   : > { %1332 = vmatpush3.bf16.msra.mxu0 %v1331_v5  ;;  %s1659_s11 = smov 112   ;;  %s1660_s26 = smov 104  }
  0x8a   : > { %1333 = vmatprep.subr.bf16.mxu0 %v1650_v0  ;;  %s1661_s24 = smov 56   ;;  %s1662_s13 = smov 48  }
  0x8b   : > { %s1663_s30 = smov 40   ;;  %s1664_s27 = smov 8  }
  0x8c   : > { %s1665_s29 = smov 16   ;;  %s1666_s14 = smov 24  }
  0x8d   : > { %1335 = vmatpush3.bf16.msra.mxu0 %v1334_v7  ;;  %v1012_v7 = vld [vmem:[#allocation7 + $0x8] sm:$0xff]  ;;  %s1239_s20 = sshll.u32 %s1714_s19, 7 }
  0x8e   : > { %1299 = vmatprep.subr.mxu0 %v1652_v1 }
  0x90   : > { %1277 = vmatmul.mubr.msk.f32.vlgmr.msra.gmra.mrb[0].mxu0 %vm260_vm1, %v255_v8  ;;  %v1337_v8 = vpack.c.bf16 %v1012_v7, %v1011_v6 }
  0x91   : > { %1301 = vmatprep.mubr.msk.f32.mxu0 %vm1651_vm0, %v1652_v1 }
 0x163   : > { %v1912_v9 = vpop.f32.mrb[0].mxu0 }
 0x164   : > { %423 = vrot.lane.b32.xlu1 %v1912_v9, %s1653_s21  ;;  %335 = vrot.lane.b32.xlu0 %v1912_v9, %s1654_s23  ;;  %v1278_v10 = vpop.f32.mrb[1].mxu0  ;;  %s254_s21 = scalar_lea.vmem [#allocation10], %s1218_s28  ;;  %s1667_s28 = smov [#allocation10]  }
 0x165   : > { %v1014_v10 = vld [vmem:[#allocation7 + $0x18] sm:$0xff]  ;;  %s1110_s23 = sshll.u32 %s254_s21, 4  ;;  %s1981_s23 = int_to_ptr.vmem [resolvable:$true] %s1110_s23 }
 0x166   : > { %s1568_s19 = scalar_lea.vmem %s1981_s23, 128 }
 0x167   : > { %p1569_p10 = scmp.ne.s32.totalorder %s1981_s23, %s1568_s19 }
 0x168   : > { %501 = vrot.lane.b32.xlu1 %v1912_v9, %s1655_s5 }
 0x169   : > { %p1570_p3 = pnand %p1569_p10, %p1838_p5 }
 0x16b   : > { %p1571_p7 = pneg %p1570_p3 }
 0x16c   : > { %499 = vrot.lane.b32.xlu1 %v1912_v9, %s1656_s7 }
 0x170   : > { %666 = vrot.lane.b32.xlu1 %v1912_v9, %s1657_s8  ;;  %s1979_s8 = scalar_lea.hbm %s2028_s4, %s1239_s20 }
 0x1d6   : > { %v424_v11 = vpop.permute.xlu1 %423  ;;  %v336_v12 = vpop.permute.xlu0 %335 }
 0x1d7   : > { %1280 = vmatpush3.xpose.msk.msra.mxu1 %vm337_vm2, %v336_v12 }
 0x1d8   : > { %1284 = vmatprep.subr.mxu1 %v1652_v1 }
 0x1da   : > { %v502_v13 = vpop.permute.xlu1 %501  ;;  %1282 = vmatmul.mubr.msk.f32.vlgmr.msra.gmra.mrb[0].mxu1 %vm337_vm2, %v1912_v9 }
 0x1db   : > { %1285 = vmatpush3.msra.mxu1 %v424_v11  ;;  %1286 = vmatprep.mubr.msk.f32.mxu1 %vm1651_vm0, %v1652_v1 }
 0x1dc   : > { %1289 = vmatprep.subr.mxu1 %v1652_v1 }
 0x1de   : > { %v500_v14 = vpop.permute.xlu1 %499 }
 0x1e2   : > { %v667_v15 = vpop.permute.xlu1 %666 }
 0x1e3   : > { %1300 = vmatpush3.xpose.msk.msra.mxu0 %vm337_vm2, %v667_v15 }
 0x1e4   : > { %1309 = vmatprep.subr.mxu0 %v1652_v1 }
 0x2ad   : > { %v408_v16 = vpop.f32.mrb[0].mxu1 }
 0x2ae   : > { %v1283_v17 = vpop.f32.mrb[1].mxu1  ;;  %v412_v18 = vsel %vm337_vm2, %v408_v16, -inf }
 0x2af   : > { %413 = vmax.xlane.f32.xlu0 %v412_v18 }
 0x2c5   : > { %831 = vrot.lane.b32.xlu0 %v1912_v9, %s1658_s9  ;;  %s1097_s9 = scalar_lea.sflag [#allocation4], %s1883_s6 }
 0x33c   : > { %v414_v19 = vpop.xlane.xlu0 %413 }
 0x33d   : > { %v415_v20 = vsub.f32 %v408_v16, %v414_v19 }
 0x33f   : > { %v416_v21 = vmul.f32 1.442695, %v415_v20 }
 0x340   : > { %v832_v26 = vpop.permute.xlu0 %831 }
 0x341   : > { %1438 = vpow2.f32 %v416_v21 }
 0x34b   : > { %v1439_v22 = vpop.eup %1438 }
 0x34c   : > { %v418_v23 = vsel %vm337_vm2, %v1439_v22, 0.0 }
 0x34d   : > { %419 = vadd.xlane.f32.xlu1 %v418_v23 }
 0x35e   : > { %664 = vrot.lane.b32.xlu1 %v1912_v9, %s1659_s11  ;;  %s1572_s11 = sshll.u32 %s1667_s28, 4  ;;  %s1573_s11 = int_to_ptr.vmem [resolvable:$false] %s1572_s11 }
 0x35f   : > { %p1575_p12 = scmp.lt.s32.totalorder %s1981_s23, %s1573_s11 }
 0x362   : > { %829 = vrot.lane.b32.xlu1 %v1912_v9, %s1660_s26  ;;  %s1574_s26 = scalar_lea.vmem %s1573_s11, 256 }
 0x363   : > { %p1576_p2 = scmp.lt.s32.totalorder %s1574_s26, %s1568_s19 }
 0x365   : > { %p1577_p1 = por %p1576_p2, %p1575_p12 }
 0x367   : > { %p1578_p4 = pnand %p1577_p1, %p1571_p7 }
 0x3da   : > { %v420_v24 = vpop.xlane.xlu1 %419 }
 0x3db   : > { %1440 = vrcp.f32 %v420_v24 }
 0x3de   : > { %v665_v25 = vpop.permute.xlu1 %664 }
 0x3df   : > { %1302 = vmatmul.mubr.msk.f32.vlgmr.msra.gmra.mrb[2].mxu0 %vm337_vm2, %v665_v25 }
 0x3e0   : > { %1310 = vmatpush3.xpose.msk.msra.mxu0 %vm337_vm2, %v832_v26  ;;  %1311 = vmatprep.mubr.msk.f32.mxu0 %vm1651_vm0, %v1652_v1 }
 0x3e1   : > { %1336 = vmatprep.subr.bf16.mxu0 %v1650_v0 }
 0x3e2   : > { %v830_v27 = vpop.permute.xlu1 %829 }
 0x3e3   : > { %1312 = vmatmul.mubr.msk.f32.vlgmr.msra.gmra.mrb[4].mxu0 %vm337_vm2, %v830_v27 }
 0x3e4   : > { %1327 = vmatprep.mubr.msk.f32.mxu0 %vm1651_vm0, %v1652_v1  ;;  %1338 = vmatpush3.bf16.msra.mxu0 %v1337_v8 }
 0x3e5   : > { %v1441_v28 = vpop.eup %1440  ;;  %1339 = vmatprep.subr.bf16.mxu0 %v1650_v0 }
 0x3e6   : > { %v422_v29 = vmul.f32 %v1441_v28, %v1439_v22  ;;  %v1236_v22 = vld [vmem:[#allocation8] ss:$0 sm:$0xff] }
 0x3e8   : > { %1287 = vmatmul.mubr.msk.f32.vlgmr.msra.gmra.mrb[2].mxu1 %vm337_vm2, %v422_v29 }
 0x3e9   : > { %1290 = vmatpush3.xpose.msk.msra.mxu1 %vm337_vm2, %v502_v13  ;;  %1291 = vmatprep.mubr.msk.f32.mxu1 %vm1651_vm0, %v1652_v1 }
 0x3ea   : > { %1294 = vmatprep.subr.mxu1 %v1652_v1 }
 0x3ec   : > { %1292 = vmatmul.mubr.msk.f32.vlgmr.msra.gmra.mrb[4].mxu1 %vm337_vm2, %v500_v14 }
 0x3ed   : > { %1296 = vmatprep.mubr.msk.f32.mxu1 %vm1651_vm0, %v1652_v1 }
 0x4b2   : > { %v738_v30 = vpop.f32.mrb[2].mxu0 }
 0x4b3   : > { %v1303_v31 = vpop.f32.mrb[3].mxu0  ;;  %v742_v32 = vsel %vm337_vm2, %v738_v30, -inf }
 0x4b4   : > { %743 = vmax.xlane.f32.xlu0 %v742_v32 }
 0x4b6   : > { %v903_v33 = vpop.f32.mrb[4].mxu0 }
 0x4b7   : > { %v1313_v34 = vpop.f32.mrb[5].mxu0  ;;  %v907_v40 = vsel %vm337_vm2, %v903_v33, -inf }
 0x4bb   : > { %v1950_v35 = vpop.f32.mrb[2].mxu1 }
 0x4bc   : > { %v1288_v36 = vpop.f32.mrb[3].mxu1 }
 0x4bf   : > { %v573_v37 = vpop.f32.mrb[4].mxu1 }
 0x4c0   : > { %v1293_v38 = vpop.f32.mrb[5].mxu1  ;;  %v577_v39 = vsel %vm337_vm2, %v573_v37, -inf }
 0x4c1   : > { %578 = vmax.xlane.f32.xlu1 %v577_v39 }
 0x4c5   : > { %908 = vmax.xlane.f32.xlu1 %v907_v40 }
 0x541   : > { %v744_v41 = vpop.xlane.xlu0 %743 }
 0x542   : > { %v745_v42 = vsub.f32 %v738_v30, %v744_v41 }
 0x544   : > { %v746_v43 = vmul.f32 1.442695, %v745_v42 }
 0x546   : > { %1442 = vpow2.f32 %v746_v43 }
 0x54e   : > { %v579_v44 = vpop.xlane.xlu1 %578 }
 0x54f   : > { %v580_v52 = vsub.f32 %v573_v37, %v579_v44 }
 0x550   : > { %v1443_v45 = vpop.eup %1442 }
 0x551   : > { %v748_v46 = vsel %vm337_vm2, %v1443_v45, 0.0  ;;  %v581_v53 = vmul.f32 1.442695, %v580_v52 }
 0x552   : > { %749 = vadd.xlane.f32.xlu1 %v748_v46  ;;  %v909_v47 = vpop.xlane.xlu1 %908 }
 0x553   : > { %v910_v48 = vsub.f32 %v903_v33, %v909_v47 }
 0x555   : > { %v911_v49 = vmul.f32 1.442695, %v910_v48 }
 0x557   : > { %1444 = vpow2.f32 %v911_v49 }
 0x558   : > { %1446 = vpow2.f32 %v581_v53 }
 0x561   : > { %v1445_v50 = vpop.eup %1444 }
 0x562   : > { %v913_v51 = vsel %vm337_vm2, %v1445_v50, 0.0  ;;  %v1447_v54 = vpop.eup %1446 }
 0x563   : > { %588 = vrot.lane.b32.xlu1 %v1912_v9, %s1661_s24  ;;  %914 = vadd.xlane.f32.xlu0 %v913_v51  ;;  %v583_v55 = vsel %vm337_vm2, %v1447_v54, 0.0 }
 0x579   : > { %753 = vrot.lane.b32.xlu0 %v1912_v9, %s1662_s13 }
 0x587   : > { %584 = vadd.xlane.f32.xlu1 %v583_v55 }
 0x598   : > { %918 = vrot.lane.b32.xlu1 %v1912_v9, %s1663_s30  ;;  %v1013_v9 = vld [vmem:[#allocation7 + $0x10] sm:$0xff] }
 0x599   : > { %v1340_v11 = vpack.c.bf16 %v1014_v10, %v1013_v9 }
 0x59b   : > { %1341 = vmatpush3.bf16.msra.mxu0 %v1340_v11 }
 0x5df   : > { %v750_v56 = vpop.xlane.xlu1 %749 }
 0x5e3   : > { %v589_v57 = vpop.permute.xlu1 %588 }
 0x5e4   : > { %1295 = vmatpush3.msra.mxu1 %v589_v57 }
 0x5e5   : > { %1304 = vmatprep.subr.mxu1 %v1652_v1 }
 0x5f0   : > { %v915_v59 = vpop.xlane.xlu0 %914 }
 0x5f4   : > { %v754_v63 = vpop.permute.xlu0 %753 }
 0x614   : > { %v585_v58 = vpop.xlane.xlu1 %584 }
 0x615   : > { %1448 = vrcp.f32 %v585_v58 }
 0x616   : > { %1450 = vrcp.f32 %v750_v56 }
 0x617   : > { %1452 = vrcp.f32 %v915_v59 }
 0x618   : > { %v919_v4 = vpop.permute.xlu1 %918 }
 0x61f   : > { %v1449_v60 = vpop.eup %1448 }
 0x620   : > { %v587_v61 = vmul.f32 %v1449_v60, %v1447_v54  ;;  %v1451_v62 = vpop.eup %1450 }
 0x621   : > { %v752_v2 = vmul.f32 %v1451_v62, %v1443_v45  ;;  %v1453_v3 = vpop.eup %1452 }
 0x622   : > { %1297 = vmatmul.mubr.msk.f32.vlgmr.msra.gmra.mrb[6].mxu1 %vm337_vm2, %v587_v61  ;;  %v917_v5 = vmul.f32 %v1453_v3, %v1445_v50 }
 0x623   : > { %1305 = vmatpush3.msra.mxu1 %v754_v63  ;;  %1306 = vmatprep.mubr.msk.f32.mxu1 %vm1651_vm0, %v1652_v1 }
 0x624   : > { %1314 = vmatprep.subr.mxu1 %v1652_v1 }
 0x626   : > { %1307 = vmatmul.mubr.msk.f32.vlgmr.msra.gmra.mrb[8].mxu1 %vm337_vm2, %v752_v2 }
 0x627   : > { %1315 = vmatpush3.msra.mxu1 %v919_v4  ;;  %1316 = vmatprep.mubr.msk.f32.mxu1 %vm1651_vm0, %v1652_v1 }
 0x62a   : > { %1317 = vmatmul.mubr.msk.f32.vlgmr.msra.gmra.mrb[10].mxu1 %vm337_vm2, %v917_v5 }
 0x6f5   : > { %v660_v12 = vpop.f32.mrb[6].mxu1 }
 0x6f6   : > { %995 = vrot.lane.b32.xlu1 %v660_v12, %s1664_s27  ;;  %v1298_v13 = vpop.f32.mrb[7].mxu1 }
 0x6f9   : > { %v825_v14 = vpop.f32.mrb[8].mxu1 }
 0x6fa   : > { %999 = vrot.lane.b32.xlu0 %v825_v14, %s1665_s29  ;;  %v1308_v1 = vpop.f32.mrb[9].mxu1 }
 0x6fd   : > { %v990_v15 = vpop.f32.mrb[10].mxu1 }
 0x6fe   : > { %1003 = vrot.lane.b32.xlu1 %v990_v15, %s1666_s14  ;;  %v1318_v16 = vpop.f32.mrb[11].mxu1 }
 0x768   : > { %v996_v17 = vpop.permute.xlu1 %995 }
 0x769   : > { %v1006_v18 = vsel %vm337_vm2, %v1950_v35, %v996_v17 }
 0x76c   : > { %v1000_v0 = vpop.permute.xlu0 %999 }
 0x76d   : > { %v1008_v19 = vsel %vm1007_vm3, %v1006_v18, %v1000_v0 }
 0x770   : > { %v1004_v20 = vpop.permute.xlu1 %1003 }
 0x771   : > { %v1010_v21 = vsel %vm1009_vm4, %v1008_v19, %v1004_v20 }
 0x772   : > { %1328 = vmatmul.mubr.msk.f32.vlgmr.msra.gmra.mrb[6].mxu0 %vm260_vm1, %v1010_v21 }
 0x845   : > { %v1091_v23 = vpop.f32.mrb[6].mxu0 }
 0x846   : > { %v1092_v24 = vadd.f32 %v1236_v22, %v1091_v23  ;;  %v1329_v25 = vpop.f32.mrb[7].mxu0 }
 0x848   : > { %1095 = vst.msk [vmem:[%s254_s21] sm:$0xff] %vm260_vm1, %v1092_v24 }
 0x849   : > { %1581 = shalt.err (!%p1578_p4)
}
 0x84a   : > { %s1582_s6 = scalar_lea.hbm %s1979_s8, 128  ;;  %s1586_s30 = scalar_lea.hbm %s2028_s4, 256 }
 0x84b   : > { %p1583_p0 = scmp.ne.s32.totalorder %s1979_s8, %s1582_s6  ;;  %p1587_p8 = scmp.lt.u32.totalorder %s1979_s8, %s2028_s4 }
 0x84c   : > { %p1588_p13 = scmp.lt.u32.totalorder %s1586_s30, %s1582_s6  ;;  %p1590_p10 = scmp.lt.u32.totalorder %s1582_s6, %s1979_s8 }
 0x84d   : > { %p1584_p9 = pnand %p1583_p0, %p1838_p5 }
 0x84e   : > { %p1589_p6 = por %p1588_p13, %p1587_p8 }
 0x84f   : > { %p1585_p11 = pneg %p1584_p9 }
 0x850   : > { %p1591_p3 = por %p1590_p10, %p1589_p6 }
 0x852   : > { %p1592_p7 = pnand %p1591_p3, %p1585_p11 }
 0x854   : > { %1595 = shalt.err (!%p1592_p7)
}
 0x855   : > { %1356 = dma.vmem_to_hbm [thread:$0]  (%p1838_p5), %s1981_s23, 128, %s1979_s8, %s1097_s9  }
 0x856 PF: > { %s1122_s14 = sand.u32 1, %s1630_s15   ;;  %p2046_p12 = scmp.ne.s32.totalorder %s2033_s22, 0 }
 0x857   : > { %p2047_p2 = scmp.ge.s32.totalorder %s1642_s18, 2  ;;  %s1123_s20 = scalar_lea.sflag [#allocation4], %s1122_s14 }
 0x859   : > { %p1373_p1 = pnand %p2047_p2, %p2046_p12 }
 0x85b   : > { %1625 = dma.done.wait (!%p1373_p1), %s1123_s20, 128  }
 0x85c   : > { %1627 = vsyncadd (!%p1373_p1), %s1123_s20, 4294967168  ;;  %p19_p4 = scmp.ge.s32.totalorder %s1824_s10, 4   ;;  %s2048_s15 = smov %s1634_s16 }
 0x85d   : > { %s2049_s16 = smov %s1638_s17  ;;  %s2050_s17 = smov %s1834_s25 }
 0x85e   : > { %s2051_s18 = smov %s1824_s10  ;;  %21 = sbr.rel (!%p19_p4) target bundleno = 7 (0x7), region = 93 }
 0x865   :  { %1128 = vsyncpa [#allocation3], 1 }
 0x866   :  { %1130 = vsyncpa [#allocation3 + $0x1], 1 }
 0x867   :  { %1131 = vsyncpa [#allocation6], 1 }
 0x868   :  { %1132 = vsyncpa [#allocation9], 1 }
 0x869   :  { %1133 = vsyncpa [#allocation4], 1 }
 0x86a   :  { %1135 = vsyncpa [#allocation4 + $0x1], 1 }

</bundles_post_ra>
